<compile_context>
chip_gen: v6e
topology: v6e:2x2x1
jax: 0.10.0
libtpu: 0.0.40
codegen_flags: <defaults>
</compile_context>

<pallas_src>
import functools

import jax
import jax.numpy as jnp
from jax.experimental import pallas as pl
from jax.experimental.pallas import tpu as pltpu


def cam_kernel(x_ref, w1_ref, b1_ref, w2_ref, b2_ref, o_ref, *, channels_last):
    x = x_ref[...]                                    # (Nb, C, HW) or (Nb, HW, C)

    # Global average pool, f32 accumulation without materializing an f32 copy of x.
    if channels_last:
        hw = x.shape[1]
        pooled = jnp.sum(x, axis=1, dtype=jnp.float32) * (1.0 / hw)   # (Nb, C)
    else:
        hw = x.shape[2]
        pooled = jnp.sum(x, axis=2, dtype=jnp.float32) * (1.0 / hw)   # (Nb, C)

    # linear_1 + ReLU  (MXU, f32 accumulation)
    h1 = jnp.dot(pooled, w1_ref[...], preferred_element_type=jnp.float32)
    h1 = jnp.maximum(h1 + b1_ref[...], 0.0)                           # (Nb, C//4)

    # linear_2 + sigmoid
    g = jnp.dot(h1, w2_ref[...], preferred_element_type=jnp.float32)
    g = jax.nn.sigmoid(g + b2_ref[...])                               # (Nb, C)

    # Per-channel gate broadcast; multiply in x's native dtype (bf16 stays bf16).
    gate = g.astype(x.dtype)
    if channels_last:
        o_ref[...] = (x * gate[:, None, :]).astype(o_ref.dtype)
    else:
        o_ref[...] = (x * gate[:, :, None]).astype(o_ref.dtype)


def _default_target_block_bytes():
    """~6 MiB generic; 4 MiB on small-VMEM chips (v7x), 8 MiB on 128 MiB-VMEM chips."""
    try:
        vmem = pltpu.get_tpu_info().vmem_capacity_bytes
        return (4 << 20) if vmem <= (64 << 20) else (8 << 20)
    except Exception:
        return 6 << 20


def cam_forward(x, w1, b1, w2, b2, *, target_block_bytes=None):
    """x: (N, C, H, W); w1: (C, C//4); b1: (1, C//4); w2: (C//4, C); b2: (1, C).

    Linear weights are stored as (in, out), i.e. PyTorch weight transposed.
    """
    N, C, H, W = x.shape
    HW = H * W
    C4 = w1.shape[1]

    if target_block_bytes is None:
        target_block_bytes = _default_target_block_bytes()

    # Layout: put a lane-dense axis last. NCHW -> (N, C, HW) is a free reshape; only
    # transpose to channels-last when HW would heavily mask lanes AND C fills them.
    channels_last = (HW % 128 != 0) and (C >= 128)
    if channels_last:
        x3 = jnp.transpose(x.reshape(N, C, HW), (0, 2, 1))   # (N, HW, C)
        blk_tail = (HW, C)
    else:
        x3 = x.reshape(N, C, HW)                              # (N, C, HW)
        blk_tail = (C, HW)

    # Samples per grid step: ~target_block_bytes per block, sublane-aligned when big,
    # and at least 2 grid steps (v7x megacore) when there is more than one sample.
    per_sample = C * HW * x.dtype.itemsize
    nb = max(1, min(N, target_block_bytes // max(per_sample, 1)))
    if nb >= 8:
        nb = (nb // 8) * 8
    if N > 1 and pl.cdiv(N, nb) < 2:
        nb = max(1, pl.cdiv(N, 2))
    grid = (pl.cdiv(N, nb),)          # ragged tail block; OOB rows never written back

    # VMEM budget from the real footprint: in + out, each double-buffered (4x block),
    # plus resident weights/biases and slack.  (Buffered(3) skipped: keeps v7x headroom.)
    block_bytes = nb * per_sample
    weight_bytes = (C * C4 + C4 + C4 * C + C) * 4
    vmem_limit = int(4 * block_bytes * 1.25) + 4 * weight_bytes + (4 << 20)
    vmem_limit = int(min(max(vmem_limit, 16 << 20), 64 << 20))

    kernel = functools.partial(cam_kernel, channels_last=channels_last)

    out = pl.pallas_call(
        kernel,
        out_shape=jax.ShapeDtypeStruct(x3.shape, x.dtype),
        grid_spec=pltpu.PrefetchScalarGridSpec(
            num_scalar_prefetch=0,
            grid=grid,
            in_specs=[
                pl.BlockSpec((nb,) + blk_tail, lambda n: (n, 0, 0)),
                pl.BlockSpec((C, C4), lambda n: (0, 0)),   # VMEM-resident across steps
                pl.BlockSpec((1, C4), lambda n: (0, 0)),
                pl.BlockSpec((C4, C), lambda n: (0, 0)),
                pl.BlockSpec((1, C), lambda n: (0, 0)),
            ],
            out_specs=pl.BlockSpec((nb,) + blk_tail, lambda n: (n, 0, 0)),
        ),
        compiler_params=pltpu.CompilerParams(
            dimension_semantics=("parallel",),
            vmem_limit_bytes=vmem_limit,
        ),
    )(x3, w1, b1, w2, b2)

    if channels_last:
        out = jnp.transpose(out, (0, 2, 1))
    return out.reshape(N, C, H, W)


def cam_reference(x, w1, b1, w2, b2):
    """Pure-JAX reference mirroring the PyTorch forward."""
    pooled = jnp.mean(x, axis=(2, 3))                      # (N, C)
    h1 = jax.nn.relu(pooled @ w1 + b1)                     # (N, C//4)
    g = jax.nn.sigmoid(h1 @ w2 + b2)                       # (N, C)
    return x * g[:, :, None, None]


def _make_params(key, c):
    c4 = c // 4
    kw1, kb1, kw2, kb2 = jax.random.split(key, 4)
    w1 = jax.random.normal(kw1, (c, c4), dtype=jnp.float32) * 0.1
    b1 = jax.random.normal(kb1, (1, c4), dtype=jnp.float32) * 0.1
    w2 = jax.random.normal(kw2, (c4, c), dtype=jnp.float32) * 0.1
    b2 = jax.random.normal(kb2, (1, c), dtype=jnp.float32) * 0.1
    return w1, b1, w2, b2


if __name__ == "__main__":
    key = jax.random.PRNGKey(0)
    k1, k2, kp1, kp2 = jax.random.split(key, 4)

    # Test 1: small shapes, HW multiple of 128 -> (N, C, HW) lane-dense path,
    # grid of 2 steps (one sample per step).
    N, C, H, W = 2, 16, 16, 16
    x = jax.random.normal(k1, (N, C, H, W), dtype=jnp.float32)
    w1, b1, w2, b2 = _make_params(kp1, C)
    out = jax.block_until_ready(cam_forward(x, w1, b1, w2, b2))
    ref = cam_reference(x, w1, b1, w2, b2)
    assert out.shape == (N, C, H, W)
    assert jnp.allclose(out, ref, atol=1e-5, rtol=1e-5)

    # Test 2: odd N + HW not a multiple of 128 with C >= 128 -> channels-last
    # (N, HW, C) path and a ragged tail block (nb=2 over N=3).
    N2, C2, H2, W2 = 3, 128, 7, 7
    x2 = jax.random.normal(k2, (N2, C2, H2, W2), dtype=jnp.float32)
    w1b, b1b, w2b, b2b = _make_params(kp2, C2)
    out2 = jax.block_until_ready(cam_forward(x2, w1b, b1b, w2b, b2b))
    ref2 = cam_reference(x2, w1b, b1b, w2b, b2b)
    assert out2.shape == (N2, C2, H2, W2)
    assert jnp.allclose(out2, ref2, atol=1e-5, rtol=1e-5)

    print("KERNEL_OK")
</pallas_src>

<mosaic_0001>
module attributes {stable_mosaic.version = 11 : i64} {
  func.func @cam_kernel(%arg0: i32, %arg1: memref<1x16x256xf32, #tpu.memory_space<vmem>>, %arg2: memref<16x4xf32, #tpu.memory_space<vmem>>, %arg3: memref<1x4xf32, #tpu.memory_space<vmem>>, %arg4: memref<4x16xf32, #tpu.memory_space<vmem>>, %arg5: memref<1x16xf32, #tpu.memory_space<vmem>>, %arg6: memref<1x16x256xf32, #tpu.memory_space<vmem>>) attributes {dimension_semantics = [#tpu.dimension_semantics<parallel>], iteration_bounds = array<i64: 2>, scalar_prefetch = 0 : i64, scratch_operands = 0 : i64, tpu.core_type = #tpu.core_type<tc>, window_params = [{transform_indices = @transform_0, window_bounds = array<i64: 1, 16, 256>}, {pipeline_mode = #tpu.pipeline_mode<synchronous>, transform_indices = @transform_1, window_bounds = array<i64: 16, 4>}, {pipeline_mode = #tpu.pipeline_mode<synchronous>, transform_indices = @transform_2, window_bounds = array<i64: 1, 4>}, {pipeline_mode = #tpu.pipeline_mode<synchronous>, transform_indices = @transform_3, window_bounds = array<i64: 4, 16>}, {pipeline_mode = #tpu.pipeline_mode<synchronous>, transform_indices = @transform_4, window_bounds = array<i64: 1, 16>}, {transform_indices = @transform_5, window_bounds = array<i64: 1, 16, 256>}]} {
    %c0 = arith.constant 0 : index
    %c0_0 = arith.constant 0 : index
    %c0_1 = arith.constant 0 : index
    %0 = vector.load %arg1[%c0, %c0_0, %c0_1] : memref<1x16x256xf32, #tpu.memory_space<vmem>>, vector<1x16x256xf32>
    %cst = arith.constant dense<0.000000e+00> : vector<1x16xf32>
    %1 = vector.multi_reduction <add>, %0, %cst [2] : vector<1x16x256xf32> to vector<1x16xf32>
    %cst_2 = arith.constant 3.906250e-03 : f32
    %2 = vector.broadcast %cst_2 : f32 to vector<1x16xf32>
    %3 = arith.mulf %1, %2 : vector<1x16xf32>
    %c0_3 = arith.constant 0 : index
    %c0_4 = arith.constant 0 : index
    %4 = vector.load %arg2[%c0_3, %c0_4] : memref<16x4xf32, #tpu.memory_space<vmem>>, vector<16x4xf32>
    %cst_5 = arith.constant dense<0.000000e+00> : vector<1x4xf32>
    %5 = tpu.matmul %3, %4, %cst_5 {dimension_numbers = #tpu.dot_dimension_numbers<[1], [0], [0], [1], [0, 0, 1, 1], [], []>} : vector<1x16xf32>, vector<16x4xf32>, vector<1x4xf32> -> vector<1x4xf32>
    %c0_6 = arith.constant 0 : index
    %c0_7 = arith.constant 0 : index
    %6 = vector.load %arg3[%c0_6, %c0_7] : memref<1x4xf32, #tpu.memory_space<vmem>>, vector<1x4xf32>
    %7 = arith.addf %5, %6 : vector<1x4xf32>
    %cst_8 = arith.constant 0.000000e+00 : f32
    %8 = vector.broadcast %cst_8 : f32 to vector<1x4xf32>
    %9 = arith.maximumf %7, %8 : vector<1x4xf32>
    %c0_9 = arith.constant 0 : index
    %c0_10 = arith.constant 0 : index
    %10 = vector.load %arg4[%c0_9, %c0_10] : memref<4x16xf32, #tpu.memory_space<vmem>>, vector<4x16xf32>
    %cst_11 = arith.constant dense<0.000000e+00> : vector<1x16xf32>
    %11 = tpu.matmul %9, %10, %cst_11 {dimension_numbers = #tpu.dot_dimension_numbers<[1], [0], [0], [1], [0, 0, 1, 1], [], []>} : vector<1x4xf32>, vector<4x16xf32>, vector<1x16xf32> -> vector<1x16xf32>
    %c0_12 = arith.constant 0 : index
    %c0_13 = arith.constant 0 : index
    %12 = vector.load %arg5[%c0_12, %c0_13] : memref<1x16xf32, #tpu.memory_space<vmem>>, vector<1x16xf32>
    %13 = arith.addf %11, %12 : vector<1x16xf32>
    %14 = arith.negf %13 : vector<1x16xf32>
    %15 = math.exp %14 : vector<1x16xf32>
    %cst_14 = arith.constant 1.000000e+00 : f32
    %16 = vector.broadcast %cst_14 : f32 to vector<1x16xf32>
    %17 = arith.addf %16, %15 : vector<1x16xf32>
    %18 = arith.divf %16, %17 : vector<1x16xf32>
    %19 = vector.shape_cast %18 : vector<1x16xf32> to vector<1x16x1xf32>
    %20 = vector.broadcast %19 : vector<1x16x1xf32> to vector<1x16x256xf32>
    %21 = arith.mulf %0, %20 : vector<1x16x256xf32>
    %c0_15 = arith.constant 0 : index
    %c0_16 = arith.constant 0 : index
    %c0_17 = arith.constant 0 : index
    %22 = vector.load %arg6[%c0_15, %c0_16, %c0_17] : memref<1x16x256xf32, #tpu.memory_space<vmem>>, vector<1x16x256xf32>
    tpu.vector_store %arg6[%c0_15, %c0_16, %c0_17], %21 {strides = array<i32>} : memref<1x16x256xf32, #tpu.memory_space<vmem>>, vector<1x16x256xf32>,
    return
  }
  func.func @transform_0(%arg0: i32) -> (i32, i32, i32) {
    %c0_i32 = arith.constant 0 : i32
    %c0_i32_0 = arith.constant 0 : i32
    %c0_i32_1 = arith.constant 0 : i32
    return %arg0, %c0_i32, %c0_i32_0 : i32, i32, i32
  }
  func.func @transform_1(%arg0: i32) -> (i32, i32) {
    %c0_i32 = arith.constant 0 : i32
    %c0_i32_0 = arith.constant 0 : i32
    %c0_i32_1 = arith.constant 0 : i32
    return %c0_i32, %c0_i32_0 : i32, i32
  }
  func.func @transform_2(%arg0: i32) -> (i32, i32) {
    %c0_i32 = arith.constant 0 : i32
    %c0_i32_0 = arith.constant 0 : i32
    %c0_i32_1 = arith.constant 0 : i32
    return %c0_i32, %c0_i32_0 : i32, i32
  }
  func.func @transform_3(%arg0: i32) -> (i32, i32) {
    %c0_i32 = arith.constant 0 : i32
    %c0_i32_0 = arith.constant 0 : i32
    %c0_i32_1 = arith.constant 0 : i32
    return %c0_i32, %c0_i32_0 : i32, i32
  }
  func.func @transform_4(%arg0: i32) -> (i32, i32) {
    %c0_i32 = arith.constant 0 : i32
    %c0_i32_0 = arith.constant 0 : i32
    %c0_i32_1 = arith.constant 0 : i32
    return %c0_i32, %c0_i32_0 : i32, i32
  }
  func.func @transform_5(%arg0: i32) -> (i32, i32, i32) {
    %c0_i32 = arith.constant 0 : i32
    %c0_i32_0 = arith.constant 0 : i32
    %c0_i32_1 = arith.constant 0 : i32
    return %arg0, %c0_i32, %c0_i32_0 : i32, i32, i32
  }
}

</mosaic_0001>

<bundles_post_ra>
// kernel: tpu_custom_call.1
= control target key start
LH: loop header
LB: loop body
LE: loop exit
PB: predicated region body
PF: predicated region fallthrough
CT: control target
= control target key end

     0   :  { %10 = vsyncpa [#allocation3], 0  ;;  %s945_s0 = inlined_call_operand.hbm [shape: f32[2,16,256], index: 0, kind: input, shape index: {}]   ;;  %s946_s1 = inlined_call_operand.vmem [shape: f32[16,4], index: 1, kind: input, shape index: {}]   ;;  %s947_s2 = inlined_call_operand.vmem [shape: f32[1,4], index: 2, kind: input, shape index: {}]   ;;  %s948_s3 = inlined_call_operand.vmem [shape: f32[4,16], index: 3, kind: input, shape index: {}]   ;;  %s949_s4 = inlined_call_operand.vmem [shape: f32[1,16], index: 4, kind: input, shape index: {}]   ;;  %s950_s5 = inlined_call_operand.hbm [shape: f32[2,16,256], index: 5, kind: output, shape index: {}]  }
   0x1   :  { %12 = vsyncpa [#allocation3 + $0x1], 0 }
   0x2   :  { %13 = vsyncpa [#allocation4], 0 }
   0x3   :  { %15 = vsyncpa [#allocation4 + $0x1], 0  ;;  %s764_s18 = smov 0   ;;  %s766_s19 = smov 0  }
   0x4   :  { %s768_s20 = smov 0   ;;  %s770_s21 = smov 0  }
   0x5 LB: > { %s785_s22 = sadd.s32 4294967295, %s724_s21   ;;  %s539_s23 = sadd.s32 4294967294, %s724_s21   ;;  %s724_s21 = sphi %s770_s21, %s965_s21   ;;  %s720_s20 = sphi %s768_s20, %s964_s20   ;;  %s716_s19 = sphi %s766_s19, %s963_s19   ;;  %s712_s18 = sphi %s764_s18, %s962_s18  }
   0x6   : > { %s789_s24 = sadd.s32 1, %s724_s21   ;;  %s28_s25 = sadd.s32 1, %s720_s20 }
   0x7   : > { %s25_s26 = ssub.s32 %s724_s21, %s789_s24  ;;  %p35_p0 = scmp.ne.s32.totalorder %s720_s20, %s716_s19 }
   0x8   : > { %p26_p1 = scmp.eq.s32.totalorder %s25_s26, 0  ;;  %p36_p2 = scmp.eq.s32.totalorder %s724_s21, 0 }
   0x9   : > { %p41_p3 = scmp.ne.s32.totalorder %s716_s19, %s712_s18  ;;  %p42_p4 = scmp.eq.s32.totalorder %s785_s22, 0 }
   0xa   : > { %s801_s27 = scalar_select %p26_p1, %s720_s20, %s28_s25  }
   0xb   : > { %p803_p5 = por %p36_p2, %p35_p0  ;;  %p807_p6 = por %p42_p4, %p41_p3 }
   0xc   : > { %p149_p7 = scmp.eq.s32.totalorder %s785_s22, 1  ;;  %p155_p8 = scmp.eq.s32.totalorder %s539_s23, 1 }
   0xd   : > { %s954_s29 = scalar_select %p807_p6, 1, 0 }
   0xe   : > { %p588_p10 = scmp.lt.s32.totalorder %s724_s21, 2  ;;  %p814_p11 = por %p149_p7, %p35_p0 }
   0xf   : > { %p818_p12 = por %p155_p8, %p41_p3  ;;  %s187_s7 = sand.u32 1, %s720_s20  }
  0x10   : > { %s955_s30 = scalar_select %p814_p11, 1, 0 }
  0x11   : > { %s956_s6 = scalar_select %p818_p12, 1, 0 }
  0x12   : > { %s557_s8 = sshll.u32 %s724_s21, 9  ;;  %s542_s9 = sshll.u32 %s187_s7, 5 }
  0x13   : > { %s827_s12 = scalar_lea.hbm %s945_s0, %s557_s8  ;;  %s191_s13 = scalar_lea.vmem [#allocation2], %s542_s9 }
  0x14   : > { %s198_s14 = sshll.u32 %s191_s13, 4  ;;  %p831_p13 = pnand %p588_p10, %p803_p5  ;;  %s835_s14 = int_to_ptr.vmem [resolvable:$true] %s198_s14 }
  0x15   : > { %s837_s16 = scalar_lea.sflag [#allocation3], %s187_s7  ;;  %s632_s17 = scalar_lea.hbm %s827_s12, 512 }
  0x16   : > { %p633_p0 = scmp.ne.s32.totalorder %s827_s12, %s632_s17  ;;  %p634_p1 = pneg %p831_p13 }
  0x17   : > { %s637_s26 = scalar_lea.hbm %s945_s0, 1024  ;;  %p638_p4 = scmp.lt.s32.totalorder %s827_s12, %s945_s0 }
  0x18   : > { %p635_p2 = pnand %p634_p1, %p633_p0  ;;  %p639_p5 = scmp.lt.s32.totalorder %s637_s26, %s632_s17 }
  0x1a   : > { %p636_p3 = pneg %p635_p2  ;;  %p640_p7 = por %p639_p5, %p638_p4 }
  0x1c   : > { %p641_p8 = pnand %p640_p7, %p636_p3 }
  0x1e   : > { %644 = shalt.err (!%p641_p8)
}
  0x1f   : > { %s645_s7 = scalar_lea.vmem %s835_s14, 512  ;;  %s726_s9 = smov [#allocation2]  }
  0x20   : > { %p646_p10 = scmp.ne.s32.totalorder %s835_s14, %s645_s7  ;;  %s650_s10 = sshll.u32 %s726_s9, 4  ;;  %s651_s10 = int_to_ptr.vmem [resolvable:$false] %s650_s10 }
  0x21   : > { %s652_s11 = scalar_lea.vmem %s651_s10, 1024  ;;  %p653_p2 = scmp.lt.s32.totalorder %s835_s14, %s651_s10 }
  0x22   : > { %p648_p9 = pnand %p646_p10, %p634_p1  ;;  %p654_p12 = scmp.lt.s32.totalorder %s652_s11, %s645_s7 }
  0x24   : > { %p649_p0 = pneg %p648_p9  ;;  %p655_p11 = por %p654_p12, %p653_p2 }
  0x26   : > { %p656_p6 = pnand %p655_p11, %p649_p0 }
  0x28   : > { %659 = shalt.err (!%p656_p6)
}
  0x29   : > { %s727_s13 = smov 256   ;;  %s728_s17 = smov 16  }
  0x2a   : > { %583 = dma.hbm_to_vmem [thread:$0]  (!%p831_p13), %s827_s12, 512, %s835_s14, %s837_s16, %s727_s13, %s727_s13, %s728_s17  }
  0x2b   : > { %p545_p9 = scmp.ge.s32.totalorder %s724_s21, 1  ;;  %p206_p1 = scmp.lt.s32.totalorder %s724_s21, 3 }
  0x2d   : > { %p207_p3 = pnand %p545_p9, %p206_p1 }
  0x2e   : > { %s861_s23 = sand.u32 (!%p207_p3), 1, %s716_s19   ;;  %p958_p6 = scmp.ne.s32.totalorder (!%p207_p3), %s954_s29, 0 }
  0x2f   : > { %210 = sbr.rel (%p207_p3) target bundleno = 764 (0x2fc), region = 40  ;;  %s546_s25 = sshll.u32 (!%p207_p3), %s861_s23, 5 }
  0x30   : > { %s213_s26 = scalar_lea.sflag (!%p207_p3), [#allocation3], %s861_s23  ;;  %s216_s28 = scalar_lea.vmem (!%p207_p3), [#allocation2], %s546_s25 }
  0x34   : > { %703 = dma.done.wait (%p958_p6), %s213_s26, 512  }
  0x35   : > { %705 = vsyncadd (%p958_p6), %s213_s26, 4294966784  ;;  %v243_v0 = vld [vmem:[%s216_s28] sm:$0xff]  ;;  %v244_v1 = vld [vmem:[%s216_s28 + $0x8] sm:$0xff]  ;;  %v729_v6 = vmov 0.0   ;;  %vm730_vm0 = vmmov 0   ;;  %v260_v9 = vlaneseq  ;;  %vm271_vm1 = vcmask 130112  }
  0x36   : > { %v871_v2 = vld [vmem:[%s216_s28 + $0x10] sm:$0xff]  ;;  %v247_v3 = vadd.f32 %v244_v1, %v243_v0  ;;  %v873_v4 = vld [vmem:[%s216_s28 + $0x18] sm:$0xff]  ;;  %564 = vmatprep.subr.mxu0 %v729_v6  ;;  %v256_v7 = vld [vmem:[%s946_s1 + $0x8] sm:$0xff]  ;;  %571 = vmatprep.subr.mxu1 %v729_v6  ;;  %vm273_vm2 = vcmask 130048   ;;  %vm353_vm3 = vcmask 1043456   ;;  %vm349_vm4 = vcmask 31744  }
  0x37   : > { %v250_v5 = vadd.f32 %v873_v4, %v871_v2  ;;  %565 = vmatpush3.msra.mxu0 %v256_v7  ;;  %v255_v8 = vld [vmem:[%s946_s1] sm:$0xff]  ;;  %568 = vmatprep.mubr.msk.f32.mxu0 %vm730_vm0, %v729_v6  ;;  %v261_v10 = vand.u32 127, %v260_v9  ;;  %v263_v11 = vshrl.u32 %v260_v9, 7  ;;  %s242_s13 = scalar_lea.vmem [#allocation5], %s546_s25  ;;  %s558_s26 = sshll.u32 %s785_s22, 9 }
  0x38   : > { %248 = vadd.xlane.f32.xlu0 %v247_v3  ;;  %566 = vmatprep.subr.mxu0 %v729_v6  ;;  %v347_v22 = vld [vmem:[%s948_s3] sm:$0xf]  ;;  %s466_s17 = sshll.u32 %s242_s13, 4  ;;  %s900_s14 = scalar_lea.hbm %s950_s5, %s558_s26  ;;  %s895_s17 = int_to_ptr.vmem [resolvable:$true] %s466_s17 }
  0x39   : > { %567 = vmatpush3.msra.mxu0 %v255_v8  ;;  %573 = vmatprep.mubr.msk.f32.mxu1 %vm730_vm0, %v729_v6  ;;  %v266_v12 = vadd.s32 4294967288, %v261_v10  ;;  %v264_v14 = vsub.s32 %v261_v10, %v263_v11  ;;  %v257_v23 = vld [vmem:[%s947_s2] sm:$0x1]  ;;  %v435_v35 = vsub.s32 0, %v263_v11  ;;  %s453_s22 = scalar_lea.sflag [#allocation4], %s861_s23  ;;  %s660_s25 = scalar_lea.vmem %s895_s17, 512 }
  0x3a   : > { %572 = vmatpush3.msk.msra.mxu1 %vm353_vm3, %v347_v22  ;;  %v348_v28 = vld [vmem:[%s949_s4] sm:$0x1]  ;;  %p661_p11 = scmp.ne.s32.totalorder %s895_s17, %s660_s25  ;;  %p959_p12 = scmp.ne.s32.totalorder %s955_s30, 0 }
  0x3b   : > { %v269_v16 = vsub.s32 %v266_v12, %v263_v11  ;;  %s731_s29 = smov [#allocation5]  }
  0x3c   : > { %251 = vadd.xlane.f32.xlu0 %v250_v5  ;;  %p662_p13 = pnand %p661_p11, %p959_p12  ;;  %s664_s15 = sshll.u32 %s731_s29, 4  ;;  %s665_s15 = int_to_ptr.vmem [resolvable:$false] %s664_s15 }
  0x3d   : > { %s666_s16 = scalar_lea.vmem %s665_s15, 1024  ;;  %p667_p5 = scmp.lt.s32.totalorder %s895_s17, %s665_s15 }
  0x3e   : > { %p663_p4 = pneg %p662_p13  ;;  %p668_p7 = scmp.lt.s32.totalorder %s666_s16, %s660_s25 }
  0x40   : > { %p669_p8 = por %p668_p7, %p667_p5 }
  0x42   : > { %p670_p10 = pnand %p669_p8, %p663_p4 }
  0xc1   : > { %v249_v13 = vpop.xlane.xlu0 %248 }
  0xc2   : > { %v253_v15 = vmul.f32 0.00390625, %v249_v13 }
  0xc4   : > { %v265_v19 = vrot.slane %v253_v15, %v264_v14 }
  0xc5   : > { %v252_v17 = vpop.xlane.xlu0 %251 }
  0xc6   : > { %v254_v18 = vmul.f32 0.00390625, %v252_v17 }
  0xc8   : > { %v270_v20 = vrot.slane %v254_v18, %v269_v16 }
  0xca   : > { %v272_v21 = vsel %vm271_vm1, %v270_v20, %v265_v19 }
  0xcb   : > { %569 = vmatmul.mubr.msk.f32.vlgmr.msra.gmra.mxu0 %vm273_vm2, %v272_v21 }
 0x18b   : > { %v342_v24 = vpop.f32.mrf.mxu0 }
 0x18c   : > { %v343_v25 = vadd.f32 %v342_v24, %v257_v23 }
 0x18d   : > { %v570_v26 = vpop.f32.mrf.mxu0 }
 0x18e   : > { %v346_v27 = vmax.f32 %v343_v25, 0.0 }
 0x190   : > { %574 = vmatmul.mubr.msk.f32.vlgmr.msra.gmra.mxu1 %vm349_vm4, %v346_v27 }
 0x250   : > { %v423_v29 = vpop.f32.mrf.mxu1 }
 0x251   : > { %v424_v30 = vadd.f32 %v423_v29, %v348_v28 }
 0x252   : > { %v575_v31 = vpop.f32.mrf.mxu1 }
 0x253   : > { %v551_v32 = vmul.f32 -1.442695, %v424_v30 }
 0x255   : > { %628 = vpow2.f32 %v551_v32 }
 0x262   : > { %v629_v33 = vpop.eup %628 }
 0x263   : > { %v430_v34 = vadd.f32 1.0, %v629_v33 }
 0x265   : > { %630 = vrcp.f32 %v430_v34 }
 0x272   : > { %v631_v36 = vpop.eup %630 }
 0x273   : > { %v436_v37 = vrot.slane %v631_v36, %v435_v35 }
 0x275   : > { %438 = vbcast.lane.b32.xlu1 %v436_v37, 256 }
 0x279   : > { %442 = vbcast.lane.b32.xlu1 %v436_v37, 264 }
 0x2e7   : > { %v439_v38 = vpop.permute.xlu1 %438 }
 0x2e8   : > { %v444_v39 = vmul.f32 %v439_v38, %v243_v0  ;;  %v445_v40 = vmul.f32 %v439_v38, %v244_v1 }
 0x2ea   : > { %448 = vst [vmem:[%s242_s13] sm:$0xff] %v444_v39  ;;  %449 = vst [vmem:[%s242_s13 + $0x8] sm:$0xff] %v445_v40 }
 0x2eb   : > { %v443_v41 = vpop.permute.xlu1 %442 }
 0x2ec   : > { %v446_v42 = vmul.f32 %v443_v41, %v871_v2  ;;  %v447_v43 = vmul.f32 %v443_v41, %v873_v4 }
 0x2ee   : > { %450 = vst [vmem:[%s242_s13 + $0x10] sm:$0xff] %v446_v42  ;;  %451 = vst [vmem:[%s242_s13 + $0x18] sm:$0xff] %v447_v43 }
 0x2ef   : > { %673 = shalt.err (!%p670_p10)
}
 0x2f0   : > { %s674_s8 = scalar_lea.hbm %s900_s14, 512  ;;  %s678_s10 = scalar_lea.hbm %s950_s5, 1024 }
 0x2f1   : > { %p675_p0 = scmp.ne.s32.totalorder %s900_s14, %s674_s8  ;;  %p679_p1 = scmp.lt.s32.totalorder %s900_s14, %s950_s5 }
 0x2f2   : > { %p680_p3 = scmp.lt.s32.totalorder %s678_s10, %s674_s8 }
 0x2f3   : > { %p676_p2 = pnand %p675_p0, %p959_p12 }
 0x2f4   : > { %p681_p6 = por %p680_p3, %p679_p1 }
 0x2f5   : > { %p677_p9 = pneg %p676_p2 }
 0x2f7   : > { %p682_p11 = pnand %p681_p6, %p677_p9 }
 0x2f9   : > { %685 = shalt.err (!%p682_p11)
}
 0x2fa   : > { %s732_s26 = smov 256   ;;  %s733_s28 = smov 16  }
 0x2fb   : > { %578 = dma.vmem_to_hbm [thread:$0]  (%p959_p12), %s895_s17, 512, %s900_s14, %s453_s22, %s732_s26, %s732_s26, %s733_s28  }
 0x2fc PF: > { %s481_s12 = sand.u32 1, %s712_s18   ;;  %p960_p13 = scmp.ne.s32.totalorder %s956_s6, 0 }
 0x2fd   : > { %p961_p4 = scmp.ge.s32.totalorder %s724_s21, 2  ;;  %s482_s25 = scalar_lea.sflag [#allocation4], %s481_s12 }
 0x2ff   : > { %p585_p5 = pnand %p961_p4, %p960_p13 }
 0x301   : > { %p586_p7 = pneg %p585_p5 }
 0x303   : > { %707 = dma.done.wait (%p586_p7), %s482_s25, 512  }
 0x304   : > { %709 = vsyncadd (%p586_p7), %s482_s25, 4294966784  ;;  %p18_p8 = scmp.ge.s32.totalorder %s789_s24, 4   ;;  %s962_s18 = smov %s716_s19 }
 0x305   : > { %s963_s19 = smov %s720_s20  ;;  %s964_s20 = smov %s801_s27 }
 0x306   : > { %s965_s21 = smov %s789_s24  ;;  %20 = sbr.rel (!%p18_p8) target bundleno = 5 (0x5), region = 85 }
 0x30b   :  { %487 = vsyncpa [#allocation3], 1 }
 0x30c   :  { %489 = vsyncpa [#allocation3 + $0x1], 1 }
 0x30d   :  { %490 = vsyncpa [#allocation4], 1 }
 0x30e   :  { %492 = vsyncpa [#allocation4 + $0x1], 1 }

</bundles_post_ra>
